<compile_context>
chip_gen: v5e
topology: v5e:2x2
jax: 0.10.0
libtpu: 0.0.40
codegen_flags: <defaults>
</compile_context>

<pallas_src>
import functools

import jax
import jax.numpy as jnp
from jax import lax
from jax.experimental import pallas as pl
from jax.experimental.pallas import tpu as pltpu


def _round_up(x, m):
    return ((x + m - 1) // m) * m


# ---------------------------------------------------------------------------
# Path A: multi-hot MXU matmul against a VMEM-resident table (small vocab).
# ---------------------------------------------------------------------------
def _multihot_kernel(gidx_ref, table_ref, bias_ref, out_ref):
    # gidx_ref : VMEM (TB, F) int32      -- this tile's (x + offsets)
    # table_ref: VMEM (V_pad, D_pad)     -- full table, resident across steps
    # bias_ref : VMEM (1, D_pad) f32
    # out_ref  : VMEM (TB, D_pad) f32    -- lane-dense store
    gidx = gidx_ref[...]
    tb, num_fields = gidx.shape
    v_pad = table_ref.shape[0]

    col = lax.broadcasted_iota(jnp.int32, (tb, v_pad), 1)
    mh = jnp.zeros((tb, v_pad), jnp.float32)
    for f in range(num_fields):                       # F is small and static
        mh = mh + (col == gidx[:, f][:, None]).astype(jnp.float32)

    acc = jnp.dot(mh.astype(table_ref.dtype), table_ref[...],
                  preferred_element_type=jnp.float32)  # (TB, D_pad) f32 on MXU
    out_ref[...] = acc + bias_ref[...]


# ---------------------------------------------------------------------------
# Path B: dynamic row-slice gather from a VMEM-resident table (bigger vocab).
# ---------------------------------------------------------------------------
def _vmem_gather_kernel(gidx_ref, bias_ref, table_ref, out_ref, *, num_fields):
    # gidx_ref : SMEM (B_pad * F,) int32 -- scalar-prefetched (x + offsets)
    # bias_ref : VMEM (1, D) f32
    # table_ref: VMEM (V_pad, D)         -- full table, resident across steps
    # out_ref  : VMEM (TB, D) f32
    batch_tile, d = out_ref.shape
    base = pl.program_id(0) * batch_tile
    bias = bias_ref[...]

    def body(r, carry):
        acc = jnp.zeros((1, d), jnp.float32)
        for f in range(num_fields):                   # inner field loop unrolled
            gid = gidx_ref[(base + r) * num_fields + f]
            acc = acc + table_ref[pl.ds(gid, 1), :].astype(jnp.float32)
        out_ref[pl.ds(r, 1), :] = acc + bias
        return carry

    lax.fori_loop(0, batch_tile, body, 0, unroll=4)


def features_linear(x_idx, offsets, table, bias, *, batch_tile=None,
                    force_gather=False):
    """x_idx: (B, F) int; offsets: (F,) int; table: (V, D); bias: (D,) f32."""
    B, F = x_idx.shape
    V, D = table.shape

    # Fold the per-field offsets into the indices in the wrapper (one cheap op).
    gidx = x_idx.astype(jnp.int32) + offsets.astype(jnp.int32)[None, :]

    if batch_tile is None:
        batch_tile = min(_round_up(B, 8), 256)
        # Keep >= 2 batch tiles when the batch allows so that
        # dimension_semantics=("parallel",) shards over v7x's two TensorCores.
        while batch_tile > 8 and pl.cdiv(B, batch_tile) < 2:
            batch_tile //= 2
    TB = batch_tile
    B_pad = _round_up(B, TB)
    if B_pad != B:
        # Padded rows gather row 0 (always valid) and are sliced off below.
        gidx = jnp.concatenate(
            [gidx, jnp.zeros((B_pad - B, F), jnp.int32)], axis=0)
    grid = (B_pad // TB,)

    bias_f32 = bias.astype(jnp.float32).reshape(1, D)
    params = pltpu.CompilerParams(
        dimension_semantics=("parallel",),
        vmem_limit_bytes=32 * 1024 * 1024)

    # ---- Path A: multi-hot MXU matmul (small vocab) ----
    if not force_gather and _round_up(V, 128) <= 4096:
        V_pad = _round_up(V, 128)
        D_pad = _round_up(D, 128)            # lane-dense output store
        table_pad = jnp.pad(table, ((0, V_pad - V), (0, D_pad - D)))
        bias_pad = jnp.pad(bias_f32, ((0, 0), (0, D_pad - D)))
        out = pl.pallas_call(
            _multihot_kernel,
            out_shape=jax.ShapeDtypeStruct((B_pad, D_pad), jnp.float32),
            grid_spec=pl.GridSpec(
                grid=grid,
                in_specs=[
                    pl.BlockSpec((TB, F), lambda i: (i, 0)),          # indices
                    pl.BlockSpec((V_pad, D_pad), lambda i: (0, 0)),   # table (resident)
                    pl.BlockSpec((1, D_pad), lambda i: (0, 0)),       # bias
                ],
                out_specs=pl.BlockSpec((TB, D_pad), lambda i: (i, 0)),
            ),
            compiler_params=params,
        )(gidx, table_pad, bias_pad)
        return out[:B, :D]

    # ---- Path B: VMEM-resident table, dynamic row-slice gather ----
    table_bytes = _round_up(V, 8) * D * table.dtype.itemsize
    if table_bytes > 12 * 1024 * 1024:
        # TODO(synk): add an HBM-resident, double-buffered DMA-gather path for
        # embedding tables that do not fit in VMEM.
        raise NotImplementedError(
            "embedding table too large for the VMEM-resident gather path")

    V_pad = _round_up(V, 8)
    table_pad = jnp.pad(table, ((0, V_pad - V), (0, 0)))
    gidx_flat = gidx.reshape(-1)      # 1-D SMEM operand (avoids 2-D SMEM padding)
    out = pl.pallas_call(
        functools.partial(_vmem_gather_kernel, num_fields=F),
        out_shape=jax.ShapeDtypeStruct((B_pad, D), jnp.float32),
        grid_spec=pltpu.PrefetchScalarGridSpec(
            num_scalar_prefetch=1,
            grid=grid,
            in_specs=[
                pl.BlockSpec((1, D), lambda i, g: (0, 0)),        # bias
                pl.BlockSpec((V_pad, D), lambda i, g: (0, 0)),    # table (resident)
            ],
            out_specs=pl.BlockSpec((TB, D), lambda i, g: (i, 0)),
        ),
        compiler_params=params,
    )(gidx_flat, bias_f32, table_pad)
    return out[:B]


if __name__ == "__main__":
    def run_case(field_dims, output_dim, batch, batch_tile=None):
        num_fields = len(field_dims)
        vocab = sum(field_dims)
        key = jax.random.PRNGKey(0)
        k_table, k_x, k_bias = jax.random.split(key, 3)

        # nn.Embedding default init ~ N(0, 1); bias random here to exercise the add.
        table = jax.random.normal(k_table, (vocab, output_dim), dtype=jnp.float32)
        bias = jax.random.normal(k_bias, (output_dim,), dtype=jnp.float32)

        # offsets = (0, cumsum(field_dims)[:-1])
        offsets = jnp.concatenate(
            [jnp.zeros((1,), jnp.int32),
             jnp.cumsum(jnp.array(field_dims, jnp.int32))[:-1]])

        # Per-field indices in [0, field_dims[f])
        maxes = jnp.array(field_dims, dtype=jnp.int32)[None, :]
        x = (jax.random.randint(k_x, (batch, num_fields), 0, 10**6) % maxes
             ).astype(jnp.int32)

        # Reference in plain JAX.
        ref = jnp.sum(table[x + offsets[None, :]], axis=1) + bias[None, :]

        for force_gather in (False, True):      # exercise both kernel paths
            out = features_linear(x, offsets, table, bias,
                                  batch_tile=batch_tile,
                                  force_gather=force_gather)
            out = jax.block_until_ready(out)
            assert out.shape == (batch, output_dim), (out.shape, force_gather)
            assert jnp.allclose(out, ref, atol=1e-5, rtol=1e-5), (
                force_gather, out, ref)

    # Module-default config: output_dim=1, small field dims, single tile.
    run_case(field_dims=(3, 4, 5, 6), output_dim=1, batch=8)
    # Multi-tile grid + batch padding + output_dim > 1.
    run_case(field_dims=(3, 4, 5, 6), output_dim=3, batch=20, batch_tile=8)

    print("KERNEL_OK")
</pallas_src>

<mosaic_0001>
module attributes {stable_mosaic.version = 11 : i64} {
  func.func @_multihot_kernel(%arg0: i32, %arg1: memref<8x4xi32, #tpu.memory_space<vmem>>, %arg2: memref<128x128xf32, #tpu.memory_space<vmem>>, %arg3: memref<1x128xf32, #tpu.memory_space<vmem>>, %arg4: memref<8x128xf32, #tpu.memory_space<vmem>>) attributes {dimension_semantics = [#tpu.dimension_semantics<parallel>], iteration_bounds = array<i64: 1>, scalar_prefetch = 0 : i64, scratch_operands = 0 : i64, tpu.core_type = #tpu.core_type<tc>, window_params = [{transform_indices = @transform_0, window_bounds = array<i64: 8, 4>}, {pipeline_mode = #tpu.pipeline_mode<synchronous>, transform_indices = @transform_1, window_bounds = array<i64: 128, 128>}, {pipeline_mode = #tpu.pipeline_mode<synchronous>, transform_indices = @transform_2, window_bounds = array<i64: 1, 128>}, {transform_indices = @transform_3, window_bounds = array<i64: 8, 128>}]} {
    %c0 = arith.constant 0 : index
    %c0_0 = arith.constant 0 : index
    %0 = vector.load %arg1[%c0, %c0_0] : memref<8x4xi32, #tpu.memory_space<vmem>>, vector<8x4xi32>
    %1 = tpu.iota {dimensions = array<i32: 1>} : vector<8x128xi32>
    %cst = arith.constant 0.000000e+00 : f32
    %2 = vector.broadcast %cst : f32 to vector<8x128xf32>
    %3 = vector.extract_strided_slice %0 {offsets = [0, 0], sizes = [8, 1], strides = [1, 1]} : vector<8x4xi32> to vector<8x1xi32>
    %4 = vector.shape_cast %3 : vector<8x1xi32> to vector<8xi32>
    %5 = vector.shape_cast %4 : vector<8xi32> to vector<8x1xi32>
    %6 = vector.broadcast %5 : vector<8x1xi32> to vector<8x128xi32>
    %7 = arith.cmpi eq, %1, %6 : vector<8x128xi32>
    %8 = arith.extui %7 : vector<8x128xi1> to vector<8x128xi32>
    %9 = arith.sitofp %8 : vector<8x128xi32> to vector<8x128xf32>
    %10 = arith.addf %2, %9 : vector<8x128xf32>
    %11 = vector.extract_strided_slice %0 {offsets = [0, 1], sizes = [8, 1], strides = [1, 1]} : vector<8x4xi32> to vector<8x1xi32>
    %12 = vector.shape_cast %11 : vector<8x1xi32> to vector<8xi32>
    %13 = vector.shape_cast %12 : vector<8xi32> to vector<8x1xi32>
    %14 = vector.broadcast %13 : vector<8x1xi32> to vector<8x128xi32>
    %15 = arith.cmpi eq, %1, %14 : vector<8x128xi32>
    %16 = arith.extui %15 : vector<8x128xi1> to vector<8x128xi32>
    %17 = arith.sitofp %16 : vector<8x128xi32> to vector<8x128xf32>
    %18 = arith.addf %10, %17 : vector<8x128xf32>
    %19 = vector.extract_strided_slice %0 {offsets = [0, 2], sizes = [8, 1], strides = [1, 1]} : vector<8x4xi32> to vector<8x1xi32>
    %20 = vector.shape_cast %19 : vector<8x1xi32> to vector<8xi32>
    %21 = vector.shape_cast %20 : vector<8xi32> to vector<8x1xi32>
    %22 = vector.broadcast %21 : vector<8x1xi32> to vector<8x128xi32>
    %23 = arith.cmpi eq, %1, %22 : vector<8x128xi32>
    %24 = arith.extui %23 : vector<8x128xi1> to vector<8x128xi32>
    %25 = arith.sitofp %24 : vector<8x128xi32> to vector<8x128xf32>
    %26 = arith.addf %18, %25 : vector<8x128xf32>
    %27 = vector.extract_strided_slice %0 {offsets = [0, 3], sizes = [8, 1], strides = [1, 1]} : vector<8x4xi32> to vector<8x1xi32>
    %28 = vector.shape_cast %27 : vector<8x1xi32> to vector<8xi32>
    %29 = vector.shape_cast %28 : vector<8xi32> to vector<8x1xi32>
    %30 = vector.broadcast %29 : vector<8x1xi32> to vector<8x128xi32>
    %31 = arith.cmpi eq, %1, %30 : vector<8x128xi32>
    %32 = arith.extui %31 : vector<8x128xi1> to vector<8x128xi32>
    %33 = arith.sitofp %32 : vector<8x128xi32> to vector<8x128xf32>
    %34 = arith.addf %26, %33 : vector<8x128xf32>
    %c0_1 = arith.constant 0 : index
    %c0_2 = arith.constant 0 : index
    %35 = vector.load %arg2[%c0_1, %c0_2] : memref<128x128xf32, #tpu.memory_space<vmem>>, vector<128x128xf32>
    %cst_3 = arith.constant dense<0.000000e+00> : vector<8x128xf32>
    %36 = tpu.matmul %34, %35, %cst_3 {dimension_numbers = #tpu.dot_dimension_numbers<[1], [0], [0], [1], [0, 0, 1, 1], [], []>} : vector<8x128xf32>, vector<128x128xf32>, vector<8x128xf32> -> vector<8x128xf32>
    %c0_4 = arith.constant 0 : index
    %c0_5 = arith.constant 0 : index
    %37 = vector.load %arg3[%c0_4, %c0_5] : memref<1x128xf32, #tpu.memory_space<vmem>>, vector<1x128xf32>
    %38 = vector.broadcast %37 : vector<1x128xf32> to vector<8x128xf32>
    %39 = arith.addf %36, %38 : vector<8x128xf32>
    %c0_6 = arith.constant 0 : index
    %c0_7 = arith.constant 0 : index
    %40 = vector.load %arg4[%c0_6, %c0_7] : memref<8x128xf32, #tpu.memory_space<vmem>>, vector<8x128xf32>
    tpu.vector_store %arg4[%c0_6, %c0_7], %39 {strides = array<i32>} : memref<8x128xf32, #tpu.memory_space<vmem>>, vector<8x128xf32>,
    return
  }
  func.func @transform_0(%arg0: i32) -> (i32, i32) {
    %c0_i32 = arith.constant 0 : i32
    %c0_i32_0 = arith.constant 0 : i32
    return %arg0, %c0_i32 : i32, i32
  }
  func.func @transform_1(%arg0: i32) -> (i32, i32) {
    %c0_i32 = arith.constant 0 : i32
    %c0_i32_0 = arith.constant 0 : i32
    %c0_i32_1 = arith.constant 0 : i32
    return %c0_i32, %c0_i32_0 : i32, i32
  }
  func.func @transform_2(%arg0: i32) -> (i32, i32) {
    %c0_i32 = arith.constant 0 : i32
    %c0_i32_0 = arith.constant 0 : i32
    %c0_i32_1 = arith.constant 0 : i32
    return %c0_i32, %c0_i32_0 : i32, i32
  }
  func.func @transform_3(%arg0: i32) -> (i32, i32) {
    %c0_i32 = arith.constant 0 : i32
    %c0_i32_0 = arith.constant 0 : i32
    return %arg0, %c0_i32 : i32, i32
  }
}

</mosaic_0001>

<bundles_post_ra>
// kernel: tpu_custom_call.1
= control target key start
LH: loop header
LB: loop body
LE: loop exit
PB: predicated region body
PF: predicated region fallthrough
CT: control target
= control target key end

     0   :  { %8 = vsyncpa [#allocation3], 0  ;;  %s232_s0 = inlined_call_operand.vmem [shape: s32[8,4], index: 0, kind: input, shape index: {}]   ;;  %s233_s1 = inlined_call_operand.hbm [shape: f32[128,128], index: 1, kind: input, shape index: {}]   ;;  %s234_s2 = inlined_call_operand.vmem [shape: f32[1,128], index: 2, kind: input, shape index: {}]   ;;  %s235_s3 = inlined_call_operand.hbm [shape: f32[8,128], index: 3, kind: output, shape index: {}]  }
   0x1   :  { %9 = vsyncpa [#allocation4], 0  ;;  %s16_s14 = sshll.u32 %s233_s1, 4  ;;  %s191_s15 = smov [#allocation2]   ;;  %s17_s14 = int_to_ptr.hbm [resolvable:$true] %s16_s14 }
   0x2   :  { %s18_s16 = sshll.u32 %s191_s15, 4  ;;  %s192_s17 = smov 128   ;;  %s19_s16 = int_to_ptr.vmem [resolvable:$true] %s18_s16 }
   0x3   :  { %s193_s18 = smov 8  }
   0x4   :  { %24 = dma.hbm_to_vmem [thread:$0]  %s17_s14, 2048, %s19_s16, [#allocation3], %s192_s17, %s192_s17, %s193_s18  }
   0x5   :  { %187 = dma.done.wait [#allocation3], 2048  }
   0x6   :  { %188 = vsyncadd [#allocation3], 4294965248  ;;  %v194_v0 = vmov 0   ;;  %v195_v1 = vmov 2   ;;  %v31_v2 = vld [vmem:[%s232_s0] sm:$0xff]  ;;  %v77_v3 = vld [vmem:[#allocation2 + $0x78] sm:$0xff]  ;;  %v32_v21 = vlaneseq }
   0x7   :  { %133 = vset.pattern.permute.xlu0 %v194_v0  ;;  %135 = vset.pattern.permute.xlu1 %v195_v1  ;;  %v76_v4 = vld [vmem:[#allocation2 + $0x70] sm:$0xff]  ;;  %v75_v5 = vld [vmem:[#allocation2 + $0x68] sm:$0xff]  ;;  %v74_v6 = vld [vmem:[#allocation2 + $0x60] sm:$0xff]  ;;  %v196_v8 = vmov 1   ;;  %v197_v9 = vmov 3   ;;  %v198_v27 = vmov 0.0  }
   0x8   :  { %35 = vperm.xlu0 %133, %v31_v2   ;;  %49 = vperm.xlu1 %135, %v31_v2   ;;  %v73_v7 = vld [vmem:[#allocation2 + $0x58] sm:$0xff]  ;;  %v72_v10 = vld [vmem:[#allocation2 + $0x50] sm:$0xff]  ;;  %v71_v11 = vld [vmem:[#allocation2 + $0x48] sm:$0xff]  ;;  %v33_v24 = vand.u32 127, %v32_v21  ;;  %s199_s21 = smov [#allocation5]   ;;  %s110_s25 = sshll.u32 %s235_s3, 4  ;;  %s111_s25 = int_to_ptr.hbm [resolvable:$true] %s110_s25 }
   0x9   :  { %82 = vmatpush.msra.mxu0 %v77_v3  ;;  %v70_v12 = vld [vmem:[#allocation2 + $0x40] sm:$0xff]  ;;  %v69_v13 = vld [vmem:[#allocation2 + $0x38] sm:$0xff]  ;;  %v68_v14 = vld [vmem:[#allocation2 + $0x30] sm:$0xff]  ;;  %s108_s22 = sshll.u32 %s199_s21, 4  ;;  %s109_s22 = int_to_ptr.vmem [resolvable:$true] %s108_s22 }
   0xa   :  { %v67_v15 = vld [vmem:[#allocation2 + $0x28] sm:$0xff]  ;;  %v66_v16 = vld [vmem:[#allocation2 + $0x20] sm:$0xff]  ;;  %v65_v17 = vld [vmem:[#allocation2 + $0x18] sm:$0xff] }
   0xb   :  { %83 = vmatpush.msra.mxu0 %v76_v4  ;;  %v64_v18 = vld [vmem:[#allocation2 + $0x10] sm:$0xff]  ;;  %v63_v19 = vld [vmem:[#allocation2 + $0x8] sm:$0xff]  ;;  %v62_v20 = vld [vmem:[#allocation2] sm:$0xff] }
   0xc   :  { %v138_v35 = vld [vmem:[%s234_s2] ss:$0 sm:$0xff] }
   0xd   :  { %84 = vmatpush.msra.mxu0 %v75_v5 }
   0xf   :  { %85 = vmatpush.msra.mxu0 %v74_v6 }
  0x10   :  { %134 = vset.pattern.permute.xlu0 %v196_v8  ;;  %136 = vset.pattern.permute.xlu1 %v197_v9 }
  0x11   :  { %42 = vperm.xlu0 %134, %v31_v2   ;;  %56 = vperm.xlu1 %136, %v31_v2  }
  0x12   :  { %86 = vmatpush.msra.mxu0 %v73_v7 }
  0x14   :  { %87 = vmatpush.msra.mxu0 %v72_v10 }
  0x16   :  { %88 = vmatpush.msra.mxu0 %v71_v11 }
  0x18   :  { %89 = vmatpush.msra.mxu0 %v70_v12 }
  0x19   :  { %137 = vset.pattern.permute.xlu0 %v197_v9 }
  0x1a   :  { %90 = vmatpush.msra.mxu0 %v69_v13 }
  0x1c   :  { %91 = vmatpush.msra.mxu0 %v68_v14 }
  0x1e   :  { %92 = vmatpush.msra.mxu0 %v67_v15 }
  0x20   :  { %93 = vmatpush.msra.mxu0 %v66_v16 }
  0x22   :  { %94 = vmatpush.msra.mxu0 %v65_v17 }
  0x24   :  { %95 = vmatpush.msra.mxu0 %v64_v18 }
  0x26   :  { %96 = vmatpush.msra.mxu0 %v63_v19 }
  0x28   :  { %97 = vmatpush.msra.mxu0 %v62_v20 }
  0x7a   :  { %v36_v22 = vpop.permute.xlu0 %35  ;;  %v50_v23 = vpop.permute.xlu1 %49 }
  0x7b   :  { %vm37_vm0 = vcmp.eq.s32.totalorder %v33_v24, %v36_v22  ;;  %vm51_vm1 = vcmp.eq.s32.totalorder %v33_v24, %v50_v23 }
  0x7c   :  { %v120_v28 = vsel %vm37_vm0, 1.0, %v198_v27  ;;  %v122_v31 = vsel %vm51_vm1, 1.0, %v198_v27 }
  0x83   :  { %v43_v25 = vpop.permute.xlu0 %42  ;;  %v57_v26 = vpop.permute.xlu1 %56 }
  0x84   :  { %vm44_vm2 = vcmp.eq.s32.totalorder %v33_v24, %v43_v25  ;;  %vm58_vm3 = vcmp.eq.s32.totalorder %v33_v24, %v57_v26 }
  0x85   :  { %v121_v29 = vsel %vm44_vm2, 1.0, %v198_v27  ;;  %v123_v32 = vsel %vm58_vm3, 1.0, %v198_v27 }
  0x86   :  { %v47_v30 = vadd.f32 %v121_v29, %v120_v28 }
  0x88   :  { %v54_v33 = vadd.f32 %v122_v31, %v47_v30 }
  0x8a   :  { %v61_v34 = vadd.f32 %v123_v32, %v54_v33 }
  0x8c   :  { %98 = vmatmul.f32.vlgmr.msra.gmra.mxu0 %v61_v34 }
 0x109   :  { %v99_v36 = vpop.f32.mrf.mxu0 }
 0x10a   :  { %v100_v37 = vadd.f32 %v138_v35, %v99_v36 }
 0x10c   :  { %102 = vst [vmem:[#allocation5] sm:$0xff] %v100_v37 }
 0x10d   :  { %113 = dma.vmem_to_hbm [thread:$0]  %s109_s22, 128, %s111_s25, [#allocation4]  }
 0x10e   :  { %189 = dma.done.wait [#allocation4], 128  }
 0x10f   :  { %190 = vsyncadd [#allocation4], 4294967168 }
 0x110   :  { %118 = vsyncpa [#allocation3], 1 }
 0x111   :  { %119 = vsyncpa [#allocation4], 1 }

</bundles_post_ra>
